<compile_context>
chip_gen: v5e
topology: v5e:2x2
jax: 0.10.0
libtpu: 0.0.40
codegen_flags: <defaults>
</compile_context>

<pallas_src>
import jax
import jax.numpy as jnp
from jax.experimental import pallas as pl
from jax.experimental.pallas import tpu as pltpu

_MAX_LANE = 2048                       # slab width: large multiple of 128 -> unmasked, wide vst/DMA
_TARGET_BLOCK_BYTES = 8 * 1024 * 1024  # ~8 MiB per block -> <=32 MiB double-buffered (in+out)
_VMEM_LIMIT_BYTES = 48 * 1024 * 1024   # headroom on v7x (64 MiB/TC) and v5e/v6e (128 MiB)
_MIN_PALLAS_BYTES = 4 * 1024 * 1024    # below this, fused jnp.maximum wins (no launch / fusion barrier)


def _sublane_multiple(dtype) -> int:
    """Rows-per-vreg packing multiple: 8 for 32-bit, 16 for 16-bit, 32 for 8-bit dtypes."""
    return max(8, 32 // jnp.dtype(dtype).itemsize)


def _choose_lane_width(total: int, sub: int):
    """Largest multiple of 128 (<= _MAX_LANE) dividing `total`.

    Prefers a width whose resulting row count is a multiple of `sub` (fully packed vregs).
    Returns None if no multiple of 128 divides `total` (truly ragged -> caller pads).
    """
    max_w = min(_MAX_LANE, (total // 128) * 128)
    best = None
    for w in range(max_w, 127, -128):
        if total % w == 0:
            if (total // w) % sub == 0:
                return w
            if best is None:
                best = w
    return best


def _hwr_kernel(x_ref, o_ref):
    # Elementwise half-wave rectification on the current VMEM tile.
    x = x_ref[...]
    o_ref[...] = jnp.maximum(x, jnp.zeros_like(x))


def halfwave_rectification_ihc(x: jax.Array, *, min_pallas_bytes: int = _MIN_PALLAS_BYTES) -> jax.Array:
    """Half-wave rectification (ReLU), matching torch's x.relu() semantics.

    Accepts any shape / float dtype; preserves shape and dtype.
    """
    orig_shape = x.shape
    orig_dtype = x.dtype
    total = x.size

    if total == 0:
        return x

    # Small / fusible inputs: the pallas_call costs more than the ReLU and blocks XLA fusion.
    if x.nbytes < min_pallas_bytes:
        return jnp.maximum(x, 0)

    itemsize = jnp.dtype(orig_dtype).itemsize
    sub = _sublane_multiple(orig_dtype)

    flat = x.reshape(-1)
    width = _choose_lane_width(total, sub)
    padded_total = total
    if width is None:
        # Truly ragged element count: pad with the op's identity (0 for ReLU) to a
        # sublane-aligned slab; allow_input_fusion lets XLA fold the pad into input DMA.
        width = _MAX_LANE
        chunk = sub * width
        padded_total = ((total + chunk - 1) // chunk) * chunk
        flat = jnp.pad(flat, (0, padded_total - total))

    rows = padded_total // width
    x2d = flat.reshape(rows, width)

    # ~8 MiB blocks, rounded down to the dtype's sublane multiple; whole array if smaller.
    block_rows = _TARGET_BLOCK_BYTES // (width * itemsize)
    block_rows = max(sub, (block_rows // sub) * sub)
    block_rows = min(block_rows, rows)
    grid = (pl.cdiv(rows, block_rows),)

    out2d = pl.pallas_call(
        _hwr_kernel,
        out_shape=jax.ShapeDtypeStruct((rows, width), orig_dtype),
        grid_spec=pl.GridSpec(
            grid=grid,
            in_specs=[pl.BlockSpec((block_rows, width), lambda i: (i, 0))],
            out_specs=pl.BlockSpec((block_rows, width), lambda i: (i, 0)),
        ),
        compiler_params=pltpu.CompilerParams(
            dimension_semantics=("parallel",),        # v7x: shard grid across both TCs
            vmem_limit_bytes=_VMEM_LIMIT_BYTES,       # 2x(in+out) 8 MiB blocks = 32 MiB < limit
            allow_input_fusion=[True],                # fuse any producer (e.g. pad/reshape) into input
        ),
        cost_estimate=pl.CostEstimate(
            flops=total,
            transcendentals=0,
            bytes_accessed=2 * total * itemsize,
        ),
    )(x2d)

    out_flat = out2d.reshape(-1)
    if padded_total != total:
        out_flat = out_flat[:total]
    return out_flat.reshape(orig_shape)


if __name__ == "__main__":
    key = jax.random.PRNGKey(0)
    k1, k2, k3 = jax.random.split(key, 3)

    # 1) Small NCHW input matching the module's typical use — force the Pallas path.
    x_small = jax.random.normal(k1, (2, 4, 16, 16), dtype=jnp.float32)
    y_small = jax.block_until_ready(halfwave_rectification_ihc(x_small, min_pallas_bytes=0))
    assert y_small.shape == x_small.shape and y_small.dtype == x_small.dtype
    assert bool(jnp.allclose(y_small, jnp.maximum(x_small, 0.0))), "small-case mismatch"

    # 2) Ragged size (total not a multiple of 128) — exercises the pad-and-slice fallback.
    x_ragged = jax.random.normal(k2, (2, 3, 37, 250), dtype=jnp.float32)
    y_ragged = jax.block_until_ready(halfwave_rectification_ihc(x_ragged, min_pallas_bytes=0))
    assert y_ragged.shape == x_ragged.shape and y_ragged.dtype == x_ragged.dtype
    assert bool(jnp.allclose(y_ragged, jnp.maximum(x_ragged, 0.0))), "ragged-case mismatch"

    # 3) Larger input (8 MiB) — exercises the pad-free, lane-dense tiled path.
    x_big = jax.random.normal(k3, (8, 16, 128, 128), dtype=jnp.float32)
    y_big = jax.block_until_ready(halfwave_rectification_ihc(x_big))
    assert y_big.shape == x_big.shape and y_big.dtype == x_big.dtype
    assert bool(jnp.allclose(y_big, jnp.maximum(x_big, 0.0))), "big-case mismatch"

    # 4) bf16 input — exercises the dtype-aware sublane multiple (16).
    x_bf16 = jax.random.normal(k3, (4, 8, 64, 128), dtype=jnp.bfloat16)
    y_bf16 = jax.block_until_ready(halfwave_rectification_ihc(x_bf16, min_pallas_bytes=0))
    assert y_bf16.shape == x_bf16.shape and y_bf16.dtype == x_bf16.dtype
    assert bool(jnp.allclose(y_bf16, jnp.maximum(x_bf16, 0))), "bf16-case mismatch"

    print("KERNEL_OK")
</pallas_src>

<mosaic_0001>
module attributes {stable_mosaic.version = 11 : i64} {
  func.func @_hwr_kernel(%arg0: i32, %arg1: memref<8x256xf32, #tpu.memory_space<vmem>>, %arg2: memref<8x256xf32, #tpu.memory_space<vmem>>) attributes {dimension_semantics = [#tpu.dimension_semantics<parallel>], iteration_bounds = array<i64: 1>, scalar_prefetch = 0 : i64, scratch_operands = 0 : i64, tpu.core_type = #tpu.core_type<tc>, window_params = [{transform_indices = @transform_0, window_bounds = array<i64: 8, 256>}, {transform_indices = @transform_1, window_bounds = array<i64: 8, 256>}]} {
    %c0 = arith.constant 0 : index
    %c0_0 = arith.constant 0 : index
    %0 = vector.load %arg1[%c0, %c0_0] : memref<8x256xf32, #tpu.memory_space<vmem>>, vector<8x256xf32>
    %cst = arith.constant 0.000000e+00 : f32
    %1 = vector.broadcast %cst : f32 to vector<8x256xf32>
    %2 = arith.maximumf %0, %1 : vector<8x256xf32>
    %c0_1 = arith.constant 0 : index
    %c0_2 = arith.constant 0 : index
    %3 = vector.load %arg2[%c0_1, %c0_2] : memref<8x256xf32, #tpu.memory_space<vmem>>, vector<8x256xf32>
    tpu.vector_store %arg2[%c0_1, %c0_2], %2 {strides = array<i32>} : memref<8x256xf32, #tpu.memory_space<vmem>>, vector<8x256xf32>,
    return
  }
  func.func @transform_0(%arg0: i32) -> (i32, i32) {
    %c0_i32 = arith.constant 0 : i32
    %c0_i32_0 = arith.constant 0 : i32
    return %arg0, %c0_i32 : i32, i32
  }
  func.func @transform_1(%arg0: i32) -> (i32, i32) {
    %c0_i32 = arith.constant 0 : i32
    %c0_i32_0 = arith.constant 0 : i32
    return %arg0, %c0_i32 : i32, i32
  }
}

</mosaic_0001>

<bundles_post_ra>
// kernel: tpu_custom_call.1
= control target key start
LH: loop header
LB: loop body
LE: loop exit
PB: predicated region body
PF: predicated region fallthrough
CT: control target
= control target key end

     0   :  { %6 = vsyncpa [#allocation3], 0  ;;  %s118_s0 = inlined_call_operand.hbm [shape: f32[8,256], index: 0, kind: input, shape index: {}]   ;;  %s119_s1 = inlined_call_operand.hbm [shape: f32[8,256], index: 1, kind: output, shape index: {}]  }
   0x1   :  { %7 = vsyncpa [#allocation4], 0  ;;  %s13_s8 = sshll.u32 %s118_s0, 4  ;;  %s100_s9 = smov [#allocation2]   ;;  %s14_s8 = int_to_ptr.hbm [resolvable:$true] %s13_s8 }
   0x2   :  { %s15_s10 = sshll.u32 %s100_s9, 4  ;;  %s16_s10 = int_to_ptr.vmem [resolvable:$true] %s15_s10 }
   0x3   :  { %18 = dma.hbm_to_vmem [thread:$0]  %s14_s8, 256, %s16_s10, [#allocation3]  }
   0x4   :  { %96 = dma.done.wait [#allocation3], 256  }
   0x5   :  { %97 = vsyncadd [#allocation3], 4294967040  ;;  %s101_s11 = smov [#allocation5]   ;;  %s36_s15 = sshll.u32 %s119_s1, 4  ;;  %v23_v0 = vld [vmem:[#allocation2] sm:$0xff]  ;;  %v24_v1 = vld [vmem:[#allocation2 + $0x8] sm:$0xff]  ;;  %s37_s15 = int_to_ptr.hbm [resolvable:$true] %s36_s15 }
   0x6   :  { %s34_s12 = sshll.u32 %s101_s11, 4  ;;  %v25_v2 = vmax.f32 %v23_v0, 0.0  ;;  %v26_v3 = vmax.f32 %v24_v1, 0.0  ;;  %s35_s12 = int_to_ptr.vmem [resolvable:$true] %s34_s12 }
   0x8   :  { %27 = vst [vmem:[#allocation5] sm:$0xff] %v25_v2 }
   0x9   :  { %28 = vst [vmem:[#allocation5 + $0x8] sm:$0xff] %v26_v3 }
   0xa   :  { %39 = dma.vmem_to_hbm [thread:$0]  %s35_s12, 256, %s37_s15, [#allocation4]  }
   0xb   :  { %98 = dma.done.wait [#allocation4], 256  }
   0xc   :  { %99 = vsyncadd [#allocation4], 4294967040 }
   0xd   :  { %44 = vsyncpa [#allocation3], 1 }
   0xe   :  { %45 = vsyncpa [#allocation4], 1 }

</bundles_post_ra>
